<compile_context>
chip_gen: v5e
topology: v5e:2x2
jax: 0.10.0
libtpu: 0.0.40
codegen_flags: <defaults>
</compile_context>

<pallas_src>
import functools

import jax
import jax.numpy as jnp
from jax.experimental import pallas as pl
from jax.experimental.pallas import tpu as pltpu


def _custom_relu_kernel(x_ref, a_ref, o_ref):
    # x_ref: (N, tile_m); a_ref: (N, 1) broadcasts per leading-dim row across
    # all lanes of the tile.
    x = x_ref[...]
    a = a_ref[...]
    # Strictly-negative elements scaled by alpha; x == 0 and NaN pass through
    # via the x branch, matching the PyTorch forward.
    o_ref[...] = jnp.where(x < 0, a * x, x)


def _pick_tile_m(M, N, itemsize, max_block_bytes):
    """Largest lane-dense (multiple-of-128) tile width within the VMEM budget."""
    target_m = max(128, (max_block_bytes // (N * itemsize)) // 128 * 128)
    if target_m >= M:
        return M
    # Prefer the largest divisor of M that is a multiple of 128 (no masked
    # tail block); otherwise fall back to the budget width and let the grid
    # use a cdiv-sized masked tail block.
    for cand in range(target_m, 127, -128):
        if M % cand == 0:
            return cand
    return target_m


@functools.partial(jax.jit, static_argnames=("max_block_bytes", "donate"))
def custom_relu(x, alpha, *, max_block_bytes=2 << 20, donate=False):
    """PReLU-style custom ReLU.  x: (N, C, H, W); alpha: (N, 1, 1, 1)."""
    N, C, H, W = x.shape
    M = C * H * W
    x2 = x.reshape(N, M)
    a2 = alpha.reshape(N, 1).astype(x.dtype)

    block_bytes = N * M * x2.dtype.itemsize
    if block_bytes <= max_block_bytes:
        # Single grid step over the whole array (the path taken at the
        # module's shapes): no per-step pipeline overhead.
        tile_m = M
    else:
        tile_m = _pick_tile_m(M, N, x2.dtype.itemsize, max_block_bytes)

    grid_m = pl.cdiv(M, tile_m)

    compiler_params = None
    if grid_m > 1:
        # "parallel" lets the runtime shard the grid across TensorCores on
        # multi-TC parts (v7x); on single-TC chips (v5e/v6e) it is a no-op.
        compiler_params = pltpu.CompilerParams(
            dimension_semantics=("parallel",),
        )

    extra_kwargs = {}
    if donate:
        # Only alias when the caller explicitly donates x (e.g. the call site
        # uses jax.jit(..., donate_argnums=0)); otherwise aliasing either
        # clobbers the caller's buffer (eager) or forces a defensive copy.
        extra_kwargs["input_output_aliases"] = {0: 0}

    out2 = pl.pallas_call(
        _custom_relu_kernel,
        out_shape=jax.ShapeDtypeStruct((N, M), x.dtype),
        grid_spec=pl.GridSpec(
            grid=(grid_m,),
            in_specs=[
                pl.BlockSpec((N, tile_m), lambda j: (0, j)),
                pl.BlockSpec((N, 1), lambda j: (0, 0)),
            ],
            out_specs=pl.BlockSpec((N, tile_m), lambda j: (0, j)),
        ),
        compiler_params=compiler_params,
        **extra_kwargs,
    )(x2, a2)
    return out2.reshape(N, C, H, W)


if __name__ == "__main__":
    key = jax.random.PRNGKey(0)
    k_alpha, k_x = jax.random.split(key)

    # nn.Parameter(torch.Tensor(128, 1, 1, 1)).uniform_(0, 0.1)
    alpha = jax.random.uniform(
        k_alpha, (128, 1, 1, 1), dtype=jnp.float32, minval=0.0, maxval=0.1
    )
    # Leading dim must be 128 to match alpha's per-row broadcast, as the
    # module implies; remaining dims kept small.
    x = jax.random.normal(k_x, (128, 4, 8, 8), dtype=jnp.float32)

    # Plain-JAX reference (kernel does not alias/mutate x by default).
    ref = jnp.where(x < 0, alpha * x, x)

    out = jax.block_until_ready(custom_relu(x, alpha))

    assert out.shape == x.shape and out.dtype == x.dtype
    assert jnp.allclose(out, ref, atol=1e-6, rtol=1e-6)

    print("KERNEL_OK")
</pallas_src>

<mosaic_0001>
module attributes {stable_mosaic.version = 11 : i64} {
  func.func @_custom_relu_kernel(%arg0: i32, %arg1: memref<128x256xf32, #tpu.memory_space<vmem>>, %arg2: memref<128x1xf32, #tpu.memory_space<vmem>>, %arg3: memref<128x256xf32, #tpu.memory_space<vmem>>) attributes {dimension_semantics = [#tpu.dimension_semantics<arbitrary>], iteration_bounds = array<i64: 1>, scalar_prefetch = 0 : i64, scratch_operands = 0 : i64, tpu.core_type = #tpu.core_type<tc>, window_params = [{transform_indices = @transform_0, window_bounds = array<i64: 128, 256>}, {pipeline_mode = #tpu.pipeline_mode<synchronous>, transform_indices = @transform_1, window_bounds = array<i64: 128, 1>}, {transform_indices = @transform_2, window_bounds = array<i64: 128, 256>}]} {
    %c0 = arith.constant 0 : index
    %c0_0 = arith.constant 0 : index
    %0 = vector.load %arg1[%c0, %c0_0] : memref<128x256xf32, #tpu.memory_space<vmem>>, vector<128x256xf32>
    %c0_1 = arith.constant 0 : index
    %c0_2 = arith.constant 0 : index
    %1 = vector.load %arg2[%c0_1, %c0_2] : memref<128x1xf32, #tpu.memory_space<vmem>>, vector<128x1xf32>
    %cst = arith.constant 0.000000e+00 : f32
    %2 = vector.broadcast %cst : f32 to vector<128x256xf32>
    %3 = arith.cmpf olt, %0, %2 : vector<128x256xf32>
    %4 = vector.broadcast %1 : vector<128x1xf32> to vector<128x256xf32>
    %5 = arith.mulf %4, %0 : vector<128x256xf32>
    %6 = arith.select %3, %5, %0 : vector<128x256xi1>, vector<128x256xf32>
    %c0_3 = arith.constant 0 : index
    %c0_4 = arith.constant 0 : index
    %7 = vector.load %arg3[%c0_3, %c0_4] : memref<128x256xf32, #tpu.memory_space<vmem>>, vector<128x256xf32>
    tpu.vector_store %arg3[%c0_3, %c0_4], %6 {strides = array<i32>} : memref<128x256xf32, #tpu.memory_space<vmem>>, vector<128x256xf32>,
    return
  }
  func.func @transform_0(%arg0: i32) -> (i32, i32) {
    %c0_i32 = arith.constant 0 : i32
    %c0_i32_0 = arith.constant 0 : i32
    return %c0_i32, %arg0 : i32, i32
  }
  func.func @transform_1(%arg0: i32) -> (i32, i32) {
    %c0_i32 = arith.constant 0 : i32
    %c0_i32_0 = arith.constant 0 : i32
    %c0_i32_1 = arith.constant 0 : i32
    return %c0_i32, %c0_i32_0 : i32, i32
  }
  func.func @transform_2(%arg0: i32) -> (i32, i32) {
    %c0_i32 = arith.constant 0 : i32
    %c0_i32_0 = arith.constant 0 : i32
    return %c0_i32, %arg0 : i32, i32
  }
}

</mosaic_0001>

<bundles_post_ra>
// kernel: custom_relu.1
= control target key start
LH: loop header
LB: loop body
LE: loop exit
PB: predicated region body
PF: predicated region fallthrough
CT: control target
= control target key end

     0   :  { %v275_v0 = vmov 0   ;;  %s533_s1 = inlined_call_operand.vmem [shape: f32[128,1], index: 1, kind: input, shape index: {}]   ;;  %s534_s0 = inlined_call_operand.vmem [shape: f32[128,256], index: 0, kind: input, shape index: {}]   ;;  %s535_s2 = inlined_call_operand.vmem [shape: f32[128,256], index: 2, kind: output, shape index: {}]  }
   0x1   :  { %274 = vset.pattern.permute.xlu2 %v275_v0  ;;  %273 = vset.pattern.permute.xlu1 %v275_v0  ;;  %v47_v1 = vld [vmem:[%s533_s1 + $0x20] sm:$0xff]  ;;  %v45_v2 = vld [vmem:[%s533_s1 + $0x10] sm:$0xff]  ;;  %v48_v4 = vld [vmem:[%s533_s1 + $0x28] sm:$0xff] }
   0x2   :  { %v43_v3 = vld [vmem:[%s533_s1] sm:$0xff]  ;;  %272 = vset.pattern.permute.xlu0 %v275_v0  ;;  %113 = vperm.xlu2 %274, %v47_v1   ;;  %v46_v5 = vld [vmem:[%s533_s1 + $0x18] sm:$0xff]  ;;  %v44_v6 = vld [vmem:[%s533_s1 + $0x8] sm:$0xff] }
   0x3   :  { %103 = vperm.xlu1 %273, %v45_v2   ;;  %93 = vperm.xlu0 %272, %v43_v3   ;;  %v51_v7 = vld [vmem:[%s533_s1 + $0x40] sm:$0xff]  ;;  %v50_v8 = vld [vmem:[%s533_s1 + $0x38] sm:$0xff]  ;;  %v49_v9 = vld [vmem:[%s533_s1 + $0x30] sm:$0xff] }
   0x4   :  { %v54_v10 = vld [vmem:[%s533_s1 + $0x58] sm:$0xff]  ;;  %v53_v11 = vld [vmem:[%s533_s1 + $0x50] sm:$0xff]  ;;  %v52_v12 = vld [vmem:[%s533_s1 + $0x48] sm:$0xff] }
   0x5   :  { %v57_v13 = vld [vmem:[%s533_s1 + $0x70] sm:$0xff]  ;;  %v56_v14 = vld [vmem:[%s533_s1 + $0x68] sm:$0xff]  ;;  %v55_v15 = vld [vmem:[%s533_s1 + $0x60] sm:$0xff] }
   0x6   :  { %v58_v16 = vld [vmem:[%s533_s1 + $0x78] sm:$0xff]  ;;  %v19_v17 = vld [vmem:[%s534_s0 + $0x40] sm:$0xff]  ;;  %v20_v18 = vld [vmem:[%s534_s0 + $0x48] sm:$0xff] }
   0x7   :  { %vm67_vm0 = vcmp.lt.f32.partialorder %v19_v17, 0.0  ;;  %vm68_vm1 = vcmp.lt.f32.partialorder %v20_v18, 0.0  ;;  %v21_v24 = vld [vmem:[%s534_s0 + $0x50] sm:$0xff]  ;;  %v22_v25 = vld [vmem:[%s534_s0 + $0x58] sm:$0xff]  ;;  %v27_v31 = vld [vmem:[%s534_s0 + $0x80] sm:$0xff] }
   0x8   :  { %vm69_vm2 = vcmp.lt.f32.partialorder %v21_v24, 0.0  ;;  %vm70_vm3 = vcmp.lt.f32.partialorder %v22_v25, 0.0  ;;  %v28_v32 = vld [vmem:[%s534_s0 + $0x88] sm:$0xff]  ;;  %vm75_vm4 = vcmp.lt.f32.partialorder %v27_v31, 0.0  ;;  %v33_v38 = vld [vmem:[%s534_s0 + $0xb0] sm:$0xff]  ;;  %v34_v39 = vld [vmem:[%s534_s0 + $0xb8] sm:$0xff] }
   0x9   :  { %vm76_vm5 = vcmp.lt.f32.partialorder %v28_v32, 0.0  ;;  %v11_v40 = vld [vmem:[%s534_s0] sm:$0xff]  ;;  %v16_v42 = vld [vmem:[%s534_s0 + $0x28] sm:$0xff]  ;;  %vm81_vm6 = vcmp.lt.f32.partialorder %v33_v38, 0.0  ;;  %vm82_vm7 = vcmp.lt.f32.partialorder %v34_v39, 0.0  ;;  %v17_v60 = vld [vmem:[%s534_s0 + $0x30] sm:$0xff] }
   0xa   :  { %118 = vperm.xlu2 %274, %v48_v4   ;;  %v15_v41 = vld [vmem:[%s534_s0 + $0x20] sm:$0xff]  ;;  %v12_v43 = vld [vmem:[%s534_s0 + $0x8] sm:$0xff]  ;;  %vm59_vm8 = vcmp.lt.f32.partialorder %v11_v40, 0.0  ;;  %vm64_vm10 = vcmp.lt.f32.partialorder %v16_v42, 0.0  ;;  %v18_v62 = vld [vmem:[%s534_s0 + $0x38] sm:$0xff]  ;;  %vm65_vm14 = vcmp.lt.f32.partialorder %v17_v60, 0.0 }
   0xb   :  { %108 = vperm.xlu1 %273, %v46_v5   ;;  %98 = vperm.xlu0 %272, %v44_v6   ;;  %vm63_vm9 = vcmp.lt.f32.partialorder %v15_v41, 0.0  ;;  %vm60_vm11 = vcmp.lt.f32.partialorder %v12_v43, 0.0  ;;  %v39_v58 = vld [vmem:[%s534_s0 + $0xe0] sm:$0xff]  ;;  %v40_v59 = vld [vmem:[%s534_s0 + $0xe8] sm:$0xff]  ;;  %v13_v63 = vld [vmem:[%s534_s0 + $0x10] sm:$0xff]  ;;  %vm66_vm15 = vcmp.lt.f32.partialorder %v18_v62, 0.0 }
   0xc   :  { %v14_v0 = vld [vmem:[%s534_s0 + $0x18] sm:$0xff]  ;;  %vm87_vm12 = vcmp.lt.f32.partialorder %v39_v58, 0.0  ;;  %vm88_vm13 = vcmp.lt.f32.partialorder %v40_v59, 0.0 }
  0x12   :  { %133 = vperm.xlu2 %274, %v51_v7  }
  0x13   :  { %128 = vperm.xlu1 %273, %v50_v8   ;;  %123 = vperm.xlu0 %272, %v49_v9  }
  0x1a   :  { %148 = vperm.xlu2 %274, %v54_v10  }
  0x1b   :  { %143 = vperm.xlu1 %273, %v53_v11   ;;  %138 = vperm.xlu0 %272, %v52_v12  }
  0x22   :  { %163 = vperm.xlu2 %274, %v57_v13  }
  0x23   :  { %158 = vperm.xlu1 %273, %v56_v14   ;;  %153 = vperm.xlu0 %272, %v55_v15   ;;  %v25_v15 = vld [vmem:[%s534_s0 + $0x70] sm:$0xff] }
  0x2b   :  { %168 = vperm.xlu0 %272, %v58_v16  }
  0x5c   :  { %v114_v19 = vpop.permute.xlu2 %113 }
  0x5d   :  { %v179_v20 = vmul.f32 %v114_v19, %v19_v17  ;;  %v180_v21 = vmul.f32 %v114_v19, %v20_v18  ;;  %v24_v19 = vld [vmem:[%s534_s0 + $0x68] sm:$0xff] }
  0x5f   :  { %v211_v22 = vsel %vm67_vm0, %v179_v20, %v19_v17  ;;  %v212_v23 = vsel %vm68_vm1, %v180_v21, %v20_v18  ;;  %vm61_vm0 = vcmp.lt.f32.partialorder %v13_v63, 0.0  ;;  %vm62_vm1 = vcmp.lt.f32.partialorder %v14_v0, 0.0  ;;  %v26_v17 = vld [vmem:[%s534_s0 + $0x78] sm:$0xff]  ;;  %v23_v18 = vld [vmem:[%s534_s0 + $0x60] sm:$0xff] }
  0x60   :  { %243 = vst [vmem:[%s535_s2 + $0x40] sm:$0xff] %v211_v22 }
  0x61   :  { %244 = vst [vmem:[%s535_s2 + $0x48] sm:$0xff] %v212_v23 }
  0x64   :  { %v119_v26 = vpop.permute.xlu2 %118 }
  0x65   :  { %v181_v27 = vmul.f32 %v119_v26, %v21_v24  ;;  %v182_v28 = vmul.f32 %v119_v26, %v22_v25 }
  0x67   :  { %v213_v29 = vsel %vm69_vm2, %v181_v27, %v21_v24  ;;  %v214_v30 = vsel %vm70_vm3, %v182_v28, %v22_v25  ;;  %vm73_vm2 = vcmp.lt.f32.partialorder %v25_v15, 0.0  ;;  %vm74_vm3 = vcmp.lt.f32.partialorder %v26_v17, 0.0 }
  0x68   :  { %245 = vst [vmem:[%s535_s2 + $0x50] sm:$0xff] %v213_v29 }
  0x69   :  { %246 = vst [vmem:[%s535_s2 + $0x58] sm:$0xff] %v214_v30  ;;  %v31_v30 = vld [vmem:[%s534_s0 + $0xa0] sm:$0xff] }
  0x6c   :  { %v134_v33 = vpop.permute.xlu2 %133 }
  0x6d   :  { %v187_v34 = vmul.f32 %v134_v33, %v27_v31  ;;  %v188_v35 = vmul.f32 %v134_v33, %v28_v32  ;;  %v30_v33 = vld [vmem:[%s534_s0 + $0x98] sm:$0xff] }
  0x6f   :  { %v219_v36 = vsel %vm75_vm4, %v187_v34, %v27_v31  ;;  %v220_v37 = vsel %vm76_vm5, %v188_v35, %v28_v32  ;;  %vm71_vm4 = vcmp.lt.f32.partialorder %v23_v18, 0.0  ;;  %vm72_vm5 = vcmp.lt.f32.partialorder %v24_v19, 0.0  ;;  %v32_v31 = vld [vmem:[%s534_s0 + $0xa8] sm:$0xff]  ;;  %v29_v32 = vld [vmem:[%s534_s0 + $0x90] sm:$0xff] }
  0x70   :  { %251 = vst [vmem:[%s535_s2 + $0x80] sm:$0xff] %v219_v36 }
  0x71   :  { %252 = vst [vmem:[%s535_s2 + $0x88] sm:$0xff] %v220_v37 }
  0x74   :  { %v149_v44 = vpop.permute.xlu2 %148 }
  0x75   :  { %v193_v45 = vmul.f32 %v149_v44, %v33_v38  ;;  %v194_v46 = vmul.f32 %v149_v44, %v34_v39  ;;  %v104_v47 = vpop.permute.xlu1 %103  ;;  %v94_v48 = vpop.permute.xlu0 %93  ;;  %v37_v44 = vld [vmem:[%s534_s0 + $0xd0] sm:$0xff] }
  0x76   :  { %v175_v49 = vmul.f32 %v104_v47, %v15_v41  ;;  %v176_v50 = vmul.f32 %v104_v47, %v16_v42  ;;  %v171_v51 = vmul.f32 %v94_v48, %v11_v40  ;;  %v172_v52 = vmul.f32 %v94_v48, %v12_v43  ;;  %v36_v47 = vld [vmem:[%s534_s0 + $0xc8] sm:$0xff] }
  0x77   :  { %v225_v53 = vsel %vm81_vm6, %v193_v45, %v33_v38  ;;  %v226_v54 = vsel %vm82_vm7, %v194_v46, %v34_v39  ;;  %vm79_vm6 = vcmp.lt.f32.partialorder %v31_v30, 0.0  ;;  %vm80_vm7 = vcmp.lt.f32.partialorder %v32_v31, 0.0  ;;  %v38_v45 = vld [vmem:[%s534_s0 + $0xd8] sm:$0xff]  ;;  %v35_v46 = vld [vmem:[%s534_s0 + $0xc0] sm:$0xff] }
  0x78   :  { %257 = vst [vmem:[%s535_s2 + $0xb0] sm:$0xff] %v225_v53  ;;  %v207_v55 = vsel %vm63_vm9, %v175_v49, %v15_v41  ;;  %v208_v56 = vsel %vm64_vm10, %v176_v50, %v16_v42  ;;  %v203_v57 = vsel %vm59_vm8, %v171_v51, %v11_v40  ;;  %v204_v61 = vsel %vm60_vm11, %v172_v52, %v12_v43 }
  0x79   :  { %258 = vst [vmem:[%s535_s2 + $0xb8] sm:$0xff] %v226_v54  ;;  %vm77_vm8 = vcmp.lt.f32.partialorder %v29_v32, 0.0  ;;  %vm78_vm9 = vcmp.lt.f32.partialorder %v30_v33, 0.0  ;;  %vm85_vm10 = vcmp.lt.f32.partialorder %v37_v44, 0.0  ;;  %vm86_vm11 = vcmp.lt.f32.partialorder %v38_v45, 0.0 }
  0x7a   :  { %239 = vst [vmem:[%s535_s2 + $0x20] sm:$0xff] %v207_v55 }
  0x7b   :  { %240 = vst [vmem:[%s535_s2 + $0x28] sm:$0xff] %v208_v56 }
  0x7c   :  { %235 = vst [vmem:[%s535_s2] sm:$0xff] %v203_v57  ;;  %v164_v1 = vpop.permute.xlu2 %163 }
  0x7d   :  { %236 = vst [vmem:[%s535_s2 + $0x8] sm:$0xff] %v204_v61  ;;  %v199_v2 = vmul.f32 %v164_v1, %v39_v58  ;;  %v200_v3 = vmul.f32 %v164_v1, %v40_v59  ;;  %v109_v4 = vpop.permute.xlu1 %108  ;;  %v99_v5 = vpop.permute.xlu0 %98 }
  0x7e   :  { %v177_v6 = vmul.f32 %v109_v4, %v17_v60  ;;  %v178_v7 = vmul.f32 %v109_v4, %v18_v62  ;;  %v173_v8 = vmul.f32 %v99_v5, %v13_v63  ;;  %v174_v9 = vmul.f32 %v99_v5, %v14_v0 }
  0x7f   :  { %v231_v10 = vsel %vm87_vm12, %v199_v2, %v39_v58  ;;  %v232_v11 = vsel %vm88_vm13, %v200_v3, %v40_v59  ;;  %vm83_vm12 = vcmp.lt.f32.partialorder %v35_v46, 0.0  ;;  %vm84_vm13 = vcmp.lt.f32.partialorder %v36_v47, 0.0  ;;  %v41_v58 = vld [vmem:[%s534_s0 + $0xf0] sm:$0xff]  ;;  %v42_v59 = vld [vmem:[%s534_s0 + $0xf8] sm:$0xff] }
  0x80   :  { %263 = vst [vmem:[%s535_s2 + $0xe0] sm:$0xff] %v231_v10  ;;  %v209_v12 = vsel %vm65_vm14, %v177_v6, %v17_v60  ;;  %v210_v13 = vsel %vm66_vm15, %v178_v7, %v18_v62  ;;  %v205_v14 = vsel %vm61_vm0, %v173_v8, %v13_v63  ;;  %v206_v16 = vsel %vm62_vm1, %v174_v9, %v14_v0 }
  0x81   :  { %264 = vst [vmem:[%s535_s2 + $0xe8] sm:$0xff] %v232_v11  ;;  %vm89_vm14 = vcmp.lt.f32.partialorder %v41_v58, 0.0  ;;  %vm90_vm15 = vcmp.lt.f32.partialorder %v42_v59, 0.0 }
  0x82   :  { %241 = vst [vmem:[%s535_s2 + $0x30] sm:$0xff] %v209_v12 }
  0x83   :  { %242 = vst [vmem:[%s535_s2 + $0x38] sm:$0xff] %v210_v13 }
  0x84   :  { %237 = vst [vmem:[%s535_s2 + $0x10] sm:$0xff] %v205_v14 }
  0x85   :  { %238 = vst [vmem:[%s535_s2 + $0x18] sm:$0xff] %v206_v16  ;;  %v129_v20 = vpop.permute.xlu1 %128  ;;  %v124_v21 = vpop.permute.xlu0 %123 }
  0x86   :  { %v185_v22 = vmul.f32 %v129_v20, %v25_v15  ;;  %v186_v23 = vmul.f32 %v129_v20, %v26_v17  ;;  %v183_v24 = vmul.f32 %v124_v21, %v23_v18  ;;  %v184_v25 = vmul.f32 %v124_v21, %v24_v19 }
  0x88   :  { %v217_v26 = vsel %vm73_vm2, %v185_v22, %v25_v15  ;;  %v218_v27 = vsel %vm74_vm3, %v186_v23, %v26_v17  ;;  %v215_v28 = vsel %vm71_vm4, %v183_v24, %v23_v18  ;;  %v216_v29 = vsel %vm72_vm5, %v184_v25, %v24_v19 }
  0x89   :  { %249 = vst [vmem:[%s535_s2 + $0x70] sm:$0xff] %v217_v26 }
  0x8a   :  { %250 = vst [vmem:[%s535_s2 + $0x78] sm:$0xff] %v218_v27 }
  0x8b   :  { %247 = vst [vmem:[%s535_s2 + $0x60] sm:$0xff] %v215_v28 }
  0x8c   :  { %248 = vst [vmem:[%s535_s2 + $0x68] sm:$0xff] %v216_v29 }
  0x8d   :  { %v144_v34 = vpop.permute.xlu1 %143  ;;  %v139_v35 = vpop.permute.xlu0 %138 }
  0x8e   :  { %v191_v36 = vmul.f32 %v144_v34, %v31_v30  ;;  %v192_v37 = vmul.f32 %v144_v34, %v32_v31  ;;  %v189_v38 = vmul.f32 %v139_v35, %v29_v32  ;;  %v190_v39 = vmul.f32 %v139_v35, %v30_v33 }
  0x90   :  { %v223_v40 = vsel %vm79_vm6, %v191_v36, %v31_v30  ;;  %v224_v41 = vsel %vm80_vm7, %v192_v37, %v32_v31  ;;  %v221_v42 = vsel %vm77_vm8, %v189_v38, %v29_v32  ;;  %v222_v43 = vsel %vm78_vm9, %v190_v39, %v30_v33 }
  0x91   :  { %255 = vst [vmem:[%s535_s2 + $0xa0] sm:$0xff] %v223_v40 }
  0x92   :  { %256 = vst [vmem:[%s535_s2 + $0xa8] sm:$0xff] %v224_v41 }
  0x93   :  { %253 = vst [vmem:[%s535_s2 + $0x90] sm:$0xff] %v221_v42 }
  0x94   :  { %254 = vst [vmem:[%s535_s2 + $0x98] sm:$0xff] %v222_v43 }
  0x95   :  { %v159_v48 = vpop.permute.xlu1 %158  ;;  %v154_v49 = vpop.permute.xlu0 %153 }
  0x96   :  { %v197_v50 = vmul.f32 %v159_v48, %v37_v44  ;;  %v198_v51 = vmul.f32 %v159_v48, %v38_v45  ;;  %v195_v52 = vmul.f32 %v154_v49, %v35_v46  ;;  %v196_v53 = vmul.f32 %v154_v49, %v36_v47 }
  0x98   :  { %v229_v54 = vsel %vm85_vm10, %v197_v50, %v37_v44  ;;  %v230_v55 = vsel %vm86_vm11, %v198_v51, %v38_v45  ;;  %v227_v56 = vsel %vm83_vm12, %v195_v52, %v35_v46  ;;  %v228_v57 = vsel %vm84_vm13, %v196_v53, %v36_v47 }
  0x99   :  { %261 = vst [vmem:[%s535_s2 + $0xd0] sm:$0xff] %v229_v54 }
  0x9a   :  { %262 = vst [vmem:[%s535_s2 + $0xd8] sm:$0xff] %v230_v55 }
  0x9b   :  { %259 = vst [vmem:[%s535_s2 + $0xc0] sm:$0xff] %v227_v56 }
  0x9c   :  { %260 = vst [vmem:[%s535_s2 + $0xc8] sm:$0xff] %v228_v57 }
  0x9d   :  { %v169_v60 = vpop.permute.xlu0 %168 }
  0x9e   :  { %v201_v61 = vmul.f32 %v169_v60, %v41_v58  ;;  %v202_v62 = vmul.f32 %v169_v60, %v42_v59 }
  0xa0   :  { %v233_v63 = vsel %vm89_vm14, %v201_v61, %v41_v58  ;;  %v234_v0 = vsel %vm90_vm15, %v202_v62, %v42_v59 }
  0xa1   :  { %265 = vst [vmem:[%s535_s2 + $0xf0] sm:$0xff] %v233_v63 }
  0xa2   :  { %266 = vst [vmem:[%s535_s2 + $0xf8] sm:$0xff] %v234_v0 }

</bundles_post_ra>
